<compile_context>
chip_gen: v6e
topology: v6e:2x2x1
jax: 0.10.0
libtpu: 0.0.40
codegen_flags: <defaults>
</compile_context>

<pallas_src>
import jax
import jax.numpy as jnp
from jax.experimental import pallas as pl
from jax.experimental.pallas import tpu as pltpu


def _round_up(x: int, m: int) -> int:
    return ((x + m - 1) // m) * m


def _implicitm_kernel(imp_ref, x_ref, o_ref):
    # imp_ref: (T_R, 1) per-row scale, x_ref/o_ref: (T_R, T_C)
    o_ref[...] = (x_ref[...] * imp_ref[...]).astype(o_ref.dtype)


def implicit_m(x_nchw: jax.Array, implicit: jax.Array) -> jax.Array:
    """Pallas implementation of ImplicitM.forward.

    x_nchw  : (N, C, H, W)
    implicit: (1, C, 1, 1)
    returns : (N, C, H, W)
    """
    N, C, H, W = x_nchw.shape
    HW = H * W
    rows = N * C
    dtype = x_nchw.dtype
    itemsize = jnp.dtype(dtype).itemsize

    # Glue reshapes (plain JAX, outside the kernel).
    x2d = x_nchw.reshape(rows, HW)
    # Pre-expand implicit to one scale per (n, c) row, in x's dtype (no
    # in-kernel dtype promotion). Cost: N*C*itemsize bytes — negligible.
    imp2d = (
        jnp.broadcast_to(implicit.reshape(1, C), (N, C))
        .reshape(rows, 1)
        .astype(dtype)
    )

    # Sublane packing multiple by element width (f32:8, bf16:16, int8/fp8:32).
    sub = {4: 8, 2: 16, 1: 32}.get(itemsize, 8)

    # Lane (spatial) tile: multiple of 128, capped at 2048 lanes.
    t_c = min(_round_up(HW, 128), 2048)
    # Row tile: multiple of `sub`, sized so one block is ~2 MiB.
    target_rows = max(sub, (2 * 1024 * 1024) // (t_c * itemsize))
    target_rows = (target_rows // sub) * sub
    t_r = min(_round_up(rows, sub), target_rows)

    grid = (pl.cdiv(rows, t_r), pl.cdiv(HW, t_c))

    out2d = pl.pallas_call(
        _implicitm_kernel,
        out_shape=jax.ShapeDtypeStruct((rows, HW), dtype),
        grid_spec=pltpu.PrefetchScalarGridSpec(
            num_scalar_prefetch=0,
            grid=grid,
            in_specs=[
                # per-row scale: one (t_r, 1) column slab per row-tile
                pl.BlockSpec((t_r, 1), lambda r, c: (r, 0)),
                # x: (t_r, t_c) tile
                pl.BlockSpec((t_r, t_c), lambda r, c: (r, c)),
            ],
            out_specs=pl.BlockSpec((t_r, t_c), lambda r, c: (r, c)),
        ),
        compiler_params=pltpu.CompilerParams(
            dimension_semantics=("parallel", "parallel"),
        ),
    )(imp2d, x2d)

    return out2d.reshape(N, C, H, W)


if __name__ == "__main__":
    key = jax.random.PRNGKey(0)
    k_imp, k_x = jax.random.split(key)

    N, C, H, W = 2, 4, 16, 16

    # Parameter init: nn.init.normal_(implicit, mean=1.0, std=0.02)
    implicit = 1.0 + 0.02 * jax.random.normal(k_imp, (1, C, 1, 1), dtype=jnp.float32)
    x = jax.random.normal(k_x, (N, C, H, W), dtype=jnp.float32)

    y = implicit_m(x, implicit)
    y = jax.block_until_ready(y)

    # Reference check against plain-JAX broadcast multiply
    y_ref = implicit * x
    assert y.shape == x.shape
    assert jnp.allclose(y, y_ref, rtol=1e-6, atol=1e-6)

    print("KERNEL_OK")
</pallas_src>

<mosaic_0001>
module attributes {stable_mosaic.version = 11 : i64} {
  func.func @_implicitm_kernel(%arg0: i32, %arg1: i32, %arg2: memref<8x1xf32, #tpu.memory_space<vmem>>, %arg3: memref<8x256xf32, #tpu.memory_space<vmem>>, %arg4: memref<8x256xf32, #tpu.memory_space<vmem>>) attributes {dimension_semantics = [#tpu.dimension_semantics<parallel>, #tpu.dimension_semantics<parallel>], iteration_bounds = array<i64: 1, 1>, scalar_prefetch = 0 : i64, scratch_operands = 0 : i64, tpu.core_type = #tpu.core_type<tc>, window_params = [{transform_indices = @transform_0, window_bounds = array<i64: 8, 1>}, {transform_indices = @transform_1, window_bounds = array<i64: 8, 256>}, {transform_indices = @transform_2, window_bounds = array<i64: 8, 256>}]} {
    %c0 = arith.constant 0 : index
    %c0_0 = arith.constant 0 : index
    %0 = vector.load %arg3[%c0, %c0_0] : memref<8x256xf32, #tpu.memory_space<vmem>>, vector<8x256xf32>
    %c0_1 = arith.constant 0 : index
    %c0_2 = arith.constant 0 : index
    %1 = vector.load %arg2[%c0_1, %c0_2] : memref<8x1xf32, #tpu.memory_space<vmem>>, vector<8x1xf32>
    %2 = vector.broadcast %1 : vector<8x1xf32> to vector<8x256xf32>
    %3 = arith.mulf %0, %2 : vector<8x256xf32>
    %c0_3 = arith.constant 0 : index
    %c0_4 = arith.constant 0 : index
    %4 = vector.load %arg4[%c0_3, %c0_4] : memref<8x256xf32, #tpu.memory_space<vmem>>, vector<8x256xf32>
    tpu.vector_store %arg4[%c0_3, %c0_4], %3 {strides = array<i32>} : memref<8x256xf32, #tpu.memory_space<vmem>>, vector<8x256xf32>,
    return
  }
  func.func @transform_0(%arg0: i32, %arg1: i32) -> (i32, i32) {
    %c0_i32 = arith.constant 0 : i32
    %c0_i32_0 = arith.constant 0 : i32
    return %arg0, %c0_i32 : i32, i32
  }
  func.func @transform_1(%arg0: i32, %arg1: i32) -> (i32, i32) {
    %c0_i32 = arith.constant 0 : i32
    return %arg0, %arg1 : i32, i32
  }
  func.func @transform_2(%arg0: i32, %arg1: i32) -> (i32, i32) {
    %c0_i32 = arith.constant 0 : i32
    return %arg0, %arg1 : i32, i32
  }
}

</mosaic_0001>

<bundles_post_ra>
// kernel: tpu_custom_call.1
= control target key start
LH: loop header
LB: loop body
LE: loop exit
PB: predicated region body
PF: predicated region fallthrough
CT: control target
= control target key end

     0   :  { %7 = vsyncpa [#allocation3], 0  ;;  %s126_s0 = inlined_call_operand.vmem [shape: f32[8,1], index: 0, kind: input, shape index: {}]   ;;  %s127_s1 = inlined_call_operand.hbm [shape: f32[8,256], index: 1, kind: input, shape index: {}]   ;;  %s128_s2 = inlined_call_operand.hbm [shape: f32[8,256], index: 2, kind: output, shape index: {}]  }
   0x1   :  { %8 = vsyncpa [#allocation4], 0  ;;  %s99_s9 = smov [#allocation2]  }
   0x2   :  { %s17_s10 = sshll.u32 %s99_s9, 4  ;;  %s18_s10 = int_to_ptr.vmem [resolvable:$true] %s17_s10 }
   0x3   :  { %s63_s11 = scalar_lea.vmem %s18_s10, 256  ;;  %p68_p1 = scmp.lt.s32.totalorder %s18_s10, %s18_s10 }
   0x4   :  { %p64_p0 = scmp.ne.s32.totalorder %s18_s10, %s63_s11  ;;  %p69_p2 = scmp.lt.s32.totalorder %s63_s11, %s63_s11 }
   0x6   :  { %p70_p3 = por %p69_p2, %p68_p1 }
   0x8   :  { %p71_p4 = pnand %p70_p3, %p64_p0 }
   0xa   :  { %74 = shalt.err (!%p71_p4)
}
   0xb   :  { %20 = dma.hbm_to_vmem [thread:$0]  %s127_s1, 256, %s18_s10, [#allocation3]  }
   0xc   :  { %95 = dma.done.wait [#allocation3], 256  }
   0xd   :  { %96 = vsyncadd [#allocation3], 4294967040  ;;  %v100_v0 = vmov 0   ;;  %v26_v1 = vld [vmem:[%s126_s0] sm:$0xff]  ;;  %v25_v3 = vld [vmem:[#allocation2 + $0x8] sm:$0xff]  ;;  %s101_s16 = smov [#allocation5]  }
   0xe   :  { %54 = vset.pattern.permute.xlu0 %v100_v0  ;;  %v24_v2 = vld [vmem:[#allocation2] sm:$0xff]  ;;  %s42_s17 = sshll.u32 %s101_s16, 4  ;;  %s43_s17 = int_to_ptr.vmem [resolvable:$true] %s42_s17 }
   0xf   :  { %29 = vperm.xlu0 %54, %v26_v1   ;;  %s75_s1 = scalar_lea.vmem %s43_s17, 256  ;;  %p80_p6 = scmp.lt.s32.totalorder %s43_s17, %s43_s17 }
  0x10   :  { %p76_p5 = scmp.ne.s32.totalorder %s43_s17, %s75_s1  ;;  %p81_p7 = scmp.lt.s32.totalorder %s75_s1, %s75_s1 }
  0x12   :  { %p82_p8 = por %p81_p7, %p80_p6 }
  0x14   :  { %p83_p9 = pnand %p82_p8, %p76_p5 }
  0x8a   :  { %v30_v4 = vpop.permute.xlu0 %29 }
  0x8b   :  { %v32_v5 = vmul.f32 %v30_v4, %v24_v2  ;;  %v33_v6 = vmul.f32 %v30_v4, %v25_v3 }
  0x8d   :  { %34 = vst [vmem:[#allocation5] sm:$0xff] %v32_v5  ;;  %35 = vst [vmem:[#allocation5 + $0x8] sm:$0xff] %v33_v6 }
  0x8e   :  { %86 = shalt.err (!%p83_p9)
}
  0x8f   :  { %45 = dma.vmem_to_hbm [thread:$0]  %s43_s17, 256, %s128_s2, [#allocation4]  }
  0x90   :  { %97 = dma.done.wait [#allocation4], 256  }
  0x91   :  { %98 = vsyncadd [#allocation4], 4294967040 }
  0x92   :  { %49 = vsyncpa [#allocation3], 1 }
  0x93   :  { %50 = vsyncpa [#allocation4], 1 }

</bundles_post_ra>
